<compile_context>
chip_gen: v5e
topology: v5e:2x2
jax: 0.10.0
libtpu: 0.0.40
codegen_flags: <defaults>
</compile_context>

<pallas_src>
import math
import functools

import jax
import jax.numpy as jnp
from jax.experimental import pallas as pl
from jax.experimental.pallas import tpu as pltpu


# ----------------------------------------------------------------------------
# in-kernel helpers
# ----------------------------------------------------------------------------
def _erf(x):
    # Abramowitz & Stegun 7.1.26 rational approximation (|err| < 1.5e-7,
    # i.e. float32-exact). Robust Mosaic lowering; exp() runs on the EUP.
    a1, a2, a3, a4, a5 = 0.254829592, -0.284496736, 1.421413741, -1.453152027, 1.061405429
    p = 0.3275911
    ax = jnp.abs(x)
    t = 1.0 / (1.0 + p * ax)
    poly = ((((a5 * t + a4) * t + a3) * t + a2) * t + a1) * t
    y = 1.0 - poly * jnp.exp(-ax * ax)
    return jnp.where(x >= 0.0, y, -y)


def _gelu_exact(x):
    # matches torch.nn.GELU() (erf-based, non-approximate); GELU(0) == 0 exactly
    return 0.5 * x * (1.0 + _erf(x * (1.0 / math.sqrt(2.0))))


# ----------------------------------------------------------------------------
# fused MLP kernel: grid = (row_tiles, hidden_tiles), hidden axis is the
# reduction ("arbitrary"), rows are "parallel".
# ----------------------------------------------------------------------------
def mlp_kernel(x_ref, w1_ref, b1_ref, w2_ref, b2_ref, o_ref, acc_ref):
    k = pl.program_id(1)

    @pl.when(k == 0)
    def _():
        acc_ref[...] = jnp.zeros_like(acc_ref)

    # fc1 (bf16 operands, f32 accumulation) + bias + exact GELU in f32
    x_bf = x_ref[...].astype(jnp.bfloat16)                    # (TM, Cin)
    h = jnp.dot(x_bf, w1_ref[...],                            # (TM, TK)
                preferred_element_type=jnp.float32) + b1_ref[...]
    h = _gelu_exact(h)

    # fc2 partial product over this hidden tile, accumulated in f32
    acc_ref[...] += jnp.dot(h.astype(jnp.bfloat16), w2_ref[...],
                            preferred_element_type=jnp.float32)

    @pl.when(k == pl.num_programs(1) - 1)
    def _():
        o_ref[...] = acc_ref[...] + b2_ref[...]               # lane-dense store


# ----------------------------------------------------------------------------
# wrapper: flatten + pad to (8, 128)-aligned, lane-dense shapes, run kernel
# ----------------------------------------------------------------------------
def mlp_forward(x, w1, b1, w2, b2, *, tile_m=256, tile_k=512):
    """x: (..., Cin) f32; w1: (Cin, H); b1: (H,); w2: (H, Cout); b2: (Cout,)."""
    assert tile_m % 8 == 0 and tile_k % 128 == 0

    orig_shape = x.shape
    c_in, hidden = w1.shape
    c_out = w2.shape[1]
    rows = math.prod(orig_shape[:-1])

    def rup(a, b):
        return (a + b - 1) // b * b

    c_in_p = rup(c_in, 128)
    c_out_p = rup(c_out, 128)
    if hidden > tile_k:
        h_p, tk = rup(hidden, tile_k), tile_k
    else:
        h_p = rup(hidden, 128)
        tk = h_p
    r_p = rup(rows, 8)
    if r_p > tile_m:
        r_p, tm = rup(r_p, tile_m), tile_m
    else:
        tm = r_p

    # zero-pad (exact: padded weights/biases are 0, GELU(0) == 0)
    x2 = jnp.pad(x.reshape(rows, c_in).astype(jnp.float32),
                 ((0, r_p - rows), (0, c_in_p - c_in)))
    w1_p = jnp.pad(w1.astype(jnp.float32),
                   ((0, c_in_p - c_in), (0, h_p - hidden))).astype(jnp.bfloat16)
    b1_p = jnp.pad(b1.reshape(1, -1).astype(jnp.float32), ((0, 0), (0, h_p - hidden)))
    w2_p = jnp.pad(w2.astype(jnp.float32),
                   ((0, h_p - hidden), (0, c_out_p - c_out))).astype(jnp.bfloat16)
    b2_p = jnp.pad(b2.reshape(1, -1).astype(jnp.float32), ((0, 0), (0, c_out_p - c_out)))

    grid = (r_p // tm, h_p // tk)

    out = pl.pallas_call(
        mlp_kernel,
        out_shape=jax.ShapeDtypeStruct((r_p, c_out_p), jnp.float32),
        grid=grid,
        in_specs=[
            pl.BlockSpec((tm, c_in_p), lambda i, k: (i, 0)),     # x row tile
            pl.BlockSpec((c_in_p, tk), lambda i, k: (0, k)),     # fc1 W column tile
            pl.BlockSpec((1, tk), lambda i, k: (0, k)),          # fc1 b tile
            pl.BlockSpec((tk, c_out_p), lambda i, k: (k, 0)),    # fc2 W row tile
            pl.BlockSpec((1, c_out_p), lambda i, k: (0, 0)),     # fc2 b (invariant)
        ],
        out_specs=pl.BlockSpec((tm, c_out_p), lambda i, k: (i, 0)),
        scratch_shapes=[pltpu.VMEM((tm, c_out_p), jnp.float32)],
        compiler_params=pltpu.CompilerParams(
            dimension_semantics=("parallel", "arbitrary")),
    )(x2, w1_p, b1_p, w2_p, b2_p)

    out = out[:rows, :c_out].reshape(*orig_shape[:-1], c_out)
    return out.astype(x.dtype)


# ----------------------------------------------------------------------------
# pure-JAX reference (f32, exact erf GELU) for correctness sanity check
# ----------------------------------------------------------------------------
def _ref_mlp(x, w1, b1, w2, b2):
    h = x @ w1 + b1
    h = 0.5 * h * (1.0 + jax.scipy.special.erf(h / math.sqrt(2.0)))
    return h @ w2 + b2
    # Dropout(p=0.0) is an identity in the reference forward as well.


# ----------------------------------------------------------------------------
if __name__ == "__main__":
    B, N, C_IN, HIDDEN = 2, 16, 128, 512            # (batch, tokens, in, hidden=4x)

    key = jax.random.PRNGKey(0)
    kx, kw1, kb1, kw2, kb2 = jax.random.split(key, 5)
    x = jax.random.normal(kx, (B, N, C_IN), dtype=jnp.float32)

    # nn.Linear default init: U(-1/sqrt(fan_in), 1/sqrt(fan_in))
    lim1 = 1.0 / math.sqrt(C_IN)
    w1 = jax.random.uniform(kw1, (C_IN, HIDDEN), jnp.float32, -lim1, lim1)
    b1 = jax.random.uniform(kb1, (HIDDEN,), jnp.float32, -lim1, lim1)
    lim2 = 1.0 / math.sqrt(HIDDEN)
    w2 = jax.random.uniform(kw2, (HIDDEN, C_IN), jnp.float32, -lim2, lim2)
    b2 = jax.random.uniform(kb2, (C_IN,), jnp.float32, -lim2, lim2)

    # tile_k=256 so the hidden axis is genuinely tiled (grid = (1, 2)) and the
    # accumulator / pl.when init-finalize path is exercised.
    out = mlp_forward(x, w1, b1, w2, b2, tile_m=256, tile_k=256)
    out = jax.block_until_ready(out)

    ref = _ref_mlp(x, w1, b1, w2, b2)
    assert out.shape == ref.shape == (B, N, C_IN)
    # tolerance accounts for bf16 MXU operands (f32 accumulation)
    max_err = float(jnp.max(jnp.abs(out - ref)))
    assert jnp.allclose(out, ref, atol=1e-2, rtol=1e-2), f"max_err={max_err}"

    print("KERNEL_OK")
</pallas_src>

<mosaic_0001>
module attributes {stable_mosaic.version = 11 : i64} {
  func.func @mlp_kernel(%arg0: i32, %arg1: i32, %arg2: memref<32x128xf32, #tpu.memory_space<vmem>>, %arg3: memref<128x256xbf16, #tpu.memory_space<vmem>>, %arg4: memref<1x256xf32, #tpu.memory_space<vmem>>, %arg5: memref<256x128xbf16, #tpu.memory_space<vmem>>, %arg6: memref<1x128xf32, #tpu.memory_space<vmem>>, %arg7: memref<32x128xf32, #tpu.memory_space<vmem>>, %arg8: memref<32x128xf32, #tpu.memory_space<vmem>>) attributes {dimension_semantics = [#tpu.dimension_semantics<parallel>, #tpu.dimension_semantics<arbitrary>], iteration_bounds = array<i64: 1, 2>, scalar_prefetch = 0 : i64, scratch_operands = 1 : i64, tpu.core_type = #tpu.core_type<tc>, window_params = [{transform_indices = @transform_0, window_bounds = array<i64: 32, 128>}, {transform_indices = @transform_1, window_bounds = array<i64: 128, 256>}, {transform_indices = @transform_2, window_bounds = array<i64: 1, 256>}, {transform_indices = @transform_3, window_bounds = array<i64: 256, 128>}, {pipeline_mode = #tpu.pipeline_mode<synchronous>, transform_indices = @transform_4, window_bounds = array<i64: 1, 128>}, {transform_indices = @transform_5, window_bounds = array<i64: 32, 128>}]} {
    %c0_i32 = arith.constant 0 : i32
    %0 = arith.cmpi eq, %arg1, %c0_i32 : i32
    %1 = arith.extui %0 : i1 to i32
    %c0_i32_0 = arith.constant 0 : i32
    %2 = arith.cmpi ne, %1, %c0_i32_0 : i32
    scf.if %2 {
      %cst_29 = arith.constant 0.000000e+00 : f32
      %59 = vector.broadcast %cst_29 : f32 to vector<32x128xf32>
      %c0_30 = arith.constant 0 : index
      %c0_31 = arith.constant 0 : index
      %60 = vector.load %arg8[%c0_30, %c0_31] : memref<32x128xf32, #tpu.memory_space<vmem>>, vector<32x128xf32>
      tpu.vector_store %arg8[%c0_30, %c0_31], %59 {strides = array<i32>} : memref<32x128xf32, #tpu.memory_space<vmem>>, vector<32x128xf32>,
    } else {
    }
    %c0 = arith.constant 0 : index
    %c0_1 = arith.constant 0 : index
    %3 = vector.load %arg2[%c0, %c0_1] : memref<32x128xf32, #tpu.memory_space<vmem>>, vector<32x128xf32>
    %4 = arith.truncf %3 : vector<32x128xf32> to vector<32x128xbf16>
    %c0_2 = arith.constant 0 : index
    %c0_3 = arith.constant 0 : index
    %5 = vector.load %arg3[%c0_2, %c0_3] : memref<128x256xbf16, #tpu.memory_space<vmem>>, vector<128x256xbf16>
    %cst = arith.constant dense<0.000000e+00> : vector<32x256xf32>
    %6 = tpu.matmul %4, %5, %cst {dimension_numbers = #tpu.dot_dimension_numbers<[1], [0], [0], [1], [0, 0, 1, 1], [], []>} : vector<32x128xbf16>, vector<128x256xbf16>, vector<32x256xf32> -> vector<32x256xf32>
    %c0_4 = arith.constant 0 : index
    %c0_5 = arith.constant 0 : index
    %7 = vector.load %arg4[%c0_4, %c0_5] : memref<1x256xf32, #tpu.memory_space<vmem>>, vector<1x256xf32>
    %8 = vector.broadcast %7 : vector<1x256xf32> to vector<32x256xf32>
    %9 = arith.addf %6, %8 : vector<32x256xf32>
    %cst_6 = arith.constant 5.000000e-01 : f32
    %10 = vector.broadcast %cst_6 : f32 to vector<32x256xf32>
    %11 = arith.mulf %10, %9 : vector<32x256xf32>
    %cst_7 = arith.constant 0.707106769 : f32
    %12 = vector.broadcast %cst_7 : f32 to vector<32x256xf32>
    %13 = arith.mulf %9, %12 : vector<32x256xf32>
    %14 = math.absf %13 : vector<32x256xf32>
    %cst_8 = arith.constant 0.327591091 : f32
    %15 = vector.broadcast %cst_8 : f32 to vector<32x256xf32>
    %16 = arith.mulf %15, %14 : vector<32x256xf32>
    %cst_9 = arith.constant 1.000000e+00 : f32
    %17 = vector.broadcast %cst_9 : f32 to vector<32x256xf32>
    %18 = arith.addf %17, %16 : vector<32x256xf32>
    %cst_10 = arith.constant 1.000000e+00 : f32
    %19 = vector.broadcast %cst_10 : f32 to vector<32x256xf32>
    %20 = arith.divf %19, %18 : vector<32x256xf32>
    %cst_11 = arith.constant 1.06140542 : f32
    %21 = vector.broadcast %cst_11 : f32 to vector<32x256xf32>
    %22 = arith.mulf %21, %20 : vector<32x256xf32>
    %cst_12 = arith.constant -1.45315206 : f32
    %23 = vector.broadcast %cst_12 : f32 to vector<32x256xf32>
    %24 = arith.addf %22, %23 : vector<32x256xf32>
    %25 = arith.mulf %24, %20 : vector<32x256xf32>
    %cst_13 = arith.constant 1.42141378 : f32
    %26 = vector.broadcast %cst_13 : f32 to vector<32x256xf32>
    %27 = arith.addf %25, %26 : vector<32x256xf32>
    %28 = arith.mulf %27, %20 : vector<32x256xf32>
    %cst_14 = arith.constant -0.284496725 : f32
    %29 = vector.broadcast %cst_14 : f32 to vector<32x256xf32>
    %30 = arith.addf %28, %29 : vector<32x256xf32>
    %31 = arith.mulf %30, %20 : vector<32x256xf32>
    %cst_15 = arith.constant 0.254829586 : f32
    %32 = vector.broadcast %cst_15 : f32 to vector<32x256xf32>
    %33 = arith.addf %31, %32 : vector<32x256xf32>
    %34 = arith.mulf %33, %20 : vector<32x256xf32>
    %cst_16 = arith.constant 0.000000e+00 : f32
    %35 = vector.broadcast %cst_16 : f32 to vector<32x256xf32>
    %36 = arith.subf %35, %14 : vector<32x256xf32>
    %37 = arith.mulf %36, %14 : vector<32x256xf32>
    %38 = math.exp %37 : vector<32x256xf32>
    %39 = arith.mulf %34, %38 : vector<32x256xf32>
    %cst_17 = arith.constant 1.000000e+00 : f32
    %40 = vector.broadcast %cst_17 : f32 to vector<32x256xf32>
    %41 = arith.subf %40, %39 : vector<32x256xf32>
    %cst_18 = arith.constant 0.000000e+00 : f32
    %42 = vector.broadcast %cst_18 : f32 to vector<32x256xf32>
    %43 = arith.cmpf oge, %13, %42 : vector<32x256xf32>
    %cst_19 = arith.constant 0.000000e+00 : f32
    %44 = vector.broadcast %cst_19 : f32 to vector<32x256xf32>
    %45 = arith.subf %44, %41 : vector<32x256xf32>
    %46 = arith.select %43, %41, %45 : vector<32x256xi1>, vector<32x256xf32>
    %cst_20 = arith.constant 1.000000e+00 : f32
    %47 = vector.broadcast %cst_20 : f32 to vector<32x256xf32>
    %48 = arith.addf %47, %46 : vector<32x256xf32>
    %49 = arith.mulf %11, %48 : vector<32x256xf32>
    %c0_21 = arith.constant 0 : index
    %c0_22 = arith.constant 0 : index
    %50 = vector.load %arg8[%c0_21, %c0_22] : memref<32x128xf32, #tpu.memory_space<vmem>>, vector<32x128xf32>
    %51 = arith.truncf %49 : vector<32x256xf32> to vector<32x256xbf16>
    %c0_23 = arith.constant 0 : index
    %c0_24 = arith.constant 0 : index
    %52 = vector.load %arg5[%c0_23, %c0_24] : memref<256x128xbf16, #tpu.memory_space<vmem>>, vector<256x128xbf16>
    %cst_25 = arith.constant dense<0.000000e+00> : vector<32x128xf32>
    %53 = tpu.matmul %51, %52, %cst_25 {dimension_numbers = #tpu.dot_dimension_numbers<[1], [0], [0], [1], [0, 0, 1, 1], [], []>} : vector<32x256xbf16>, vector<256x128xbf16>, vector<32x128xf32> -> vector<32x128xf32>
    %54 = arith.addf %50, %53 : vector<32x128xf32>
    %c0_26 = arith.constant 0 : index
    %c0_27 = arith.constant 0 : index
    %55 = vector.load %arg8[%c0_26, %c0_27] : memref<32x128xf32, #tpu.memory_space<vmem>>, vector<32x128xf32>
    tpu.vector_store %arg8[%c0_26, %c0_27], %54 {strides = array<i32>} : memref<32x128xf32, #tpu.memory_space<vmem>>, vector<32x128xf32>,
    %c1_i32 = arith.constant 1 : i32
    %56 = arith.cmpi eq, %arg1, %c1_i32 : i32
    %57 = arith.extui %56 : i1 to i32
    %c0_i32_28 = arith.constant 0 : i32
    %58 = arith.cmpi ne, %57, %c0_i32_28 : i32
    scf.if %58 {
      %c0_29 = arith.constant 0 : index
      %c0_30 = arith.constant 0 : index
      %59 = vector.load %arg8[%c0_29, %c0_30] : memref<32x128xf32, #tpu.memory_space<vmem>>, vector<32x128xf32>
      %c0_31 = arith.constant 0 : index
      %c0_32 = arith.constant 0 : index
      %60 = vector.load %arg6[%c0_31, %c0_32] : memref<1x128xf32, #tpu.memory_space<vmem>>, vector<1x128xf32>
      %61 = vector.broadcast %60 : vector<1x128xf32> to vector<32x128xf32>
      %62 = arith.addf %59, %61 : vector<32x128xf32>
      %c0_33 = arith.constant 0 : index
      %c0_34 = arith.constant 0 : index
      %63 = vector.load %arg7[%c0_33, %c0_34] : memref<32x128xf32, #tpu.memory_space<vmem>>, vector<32x128xf32>
      tpu.vector_store %arg7[%c0_33, %c0_34], %62 {strides = array<i32>} : memref<32x128xf32, #tpu.memory_space<vmem>>, vector<32x128xf32>,
    } else {
    }
    return
  }
  func.func @transform_0(%arg0: i32, %arg1: i32) -> (i32, i32) {
    %c0_i32 = arith.constant 0 : i32
    %c0_i32_0 = arith.constant 0 : i32
    return %arg0, %c0_i32 : i32, i32
  }
  func.func @transform_1(%arg0: i32, %arg1: i32) -> (i32, i32) {
    %c0_i32 = arith.constant 0 : i32
    %c0_i32_0 = arith.constant 0 : i32
    return %c0_i32, %arg1 : i32, i32
  }
  func.func @transform_2(%arg0: i32, %arg1: i32) -> (i32, i32) {
    %c0_i32 = arith.constant 0 : i32
    %c0_i32_0 = arith.constant 0 : i32
    return %c0_i32, %arg1 : i32, i32
  }
  func.func @transform_3(%arg0: i32, %arg1: i32) -> (i32, i32) {
    %c0_i32 = arith.constant 0 : i32
    %c0_i32_0 = arith.constant 0 : i32
    return %arg1, %c0_i32 : i32, i32
  }
  func.func @transform_4(%arg0: i32, %arg1: i32) -> (i32, i32) {
    %c0_i32 = arith.constant 0 : i32
    %c0_i32_0 = arith.constant 0 : i32
    %c0_i32_1 = arith.constant 0 : i32
    return %c0_i32, %c0_i32_0 : i32, i32
  }
  func.func @transform_5(%arg0: i32, %arg1: i32) -> (i32, i32) {
    %c0_i32 = arith.constant 0 : i32
    %c0_i32_0 = arith.constant 0 : i32
    return %arg0, %c0_i32 : i32, i32
  }
}

</mosaic_0001>

<bundles_post_ra>
// kernel: tpu_custom_call.1
= control target key start
LH: loop header
LB: loop body
LE: loop exit
PB: predicated region body
PF: predicated region fallthrough
CT: control target
= control target key end

     0   :  { %s2334_s0 = inlined_call_operand.hbm [shape: f32[32,128], index: 0, kind: input, shape index: {}]   ;;  %s2335_s1 = inlined_call_operand.hbm [shape: bf16[128,512], index: 1, kind: input, shape index: {}]   ;;  %s2336_s2 = inlined_call_operand.hbm [shape: f32[1,512], index: 2, kind: input, shape index: {}]   ;;  %s2337_s3 = inlined_call_operand.hbm [shape: bf16[512,128], index: 3, kind: input, shape index: {}]   ;;  %s2338_s4 = inlined_call_operand.vmem [shape: f32[1,128], index: 4, kind: input, shape index: {}]   ;;  %s2339_s5 = inlined_call_operand.hbm [shape: f32[32,128], index: 5, kind: output, shape index: {}]  }
   0x1   :  { %2344 = sst [smem:[#allocation20_spill]] %s2334_s0 }
   0x2   :  { %2345 = sst [smem:[#allocation21_spill]] %s2335_s1 }
   0x3   :  { %2346 = sst [smem:[#allocation22_spill]] %s2339_s5 }
   0x4   :  { %10 = vsyncpa [#allocation4], 0 }
   0x5   :  { %11 = vsyncpa [#allocation7], 0 }
   0x6   :  { %13 = vsyncpa [#allocation7 + $0x1], 0 }
   0x7   :  { %14 = vsyncpa [#allocation10], 0 }
   0x8   :  { %16 = vsyncpa [#allocation10 + $0x1], 0 }
   0x9   :  { %17 = vsyncpa [#allocation5], 0  ;;  %s1727_s18 = smov 0   ;;  %s1729_s19 = smov 0  }
   0xa   :  { %s1731_s20 = smov 0   ;;  %s1733_s21 = smov 0  }
   0xb   :  { %s1735_s22 = smov 0   ;;  %s1737_s23 = smov 0  }
   0xc LB: > { %2347 = sst [smem:[#allocation16_spill]] %s1673_s20  ;;  %s32_s24 = sadd.s32 1, %s1681_s22  ;;  %s1685_s23 = sphi %s1737_s23, %s23_s23   ;;  %s1681_s22 = sphi %s1735_s22, %s2384_s22   ;;  %s1677_s21 = sphi %s1733_s21, %s2383_s21   ;;  %s1673_s20 = sphi %s1731_s20, %s2379_s20   ;;  %s1669_s19 = sphi %s1729_s19, %s2382_s19   ;;  %s1665_s18 = sphi %s1727_s18, %s2381_s18  }
   0xd   : > { %2348 = sst [smem:[#allocation17_spill]] %s1685_s23  ;;  %s68_s25 = sadd.s32 1, %s1673_s20 }
   0xe   : > { %p33_p0 = scmp.ge.s32.totalorder %s32_s24, 2  ;;  %p75_p1 = scmp.ne.s32.totalorder %s1673_s20, %s1669_s19 }
   0xf   : > { %p76_p2 = scmp.eq.s32.totalorder %s1685_s23, 0  ;;  %p1380_p5 = scmp.lt.s32.totalorder %s1685_s23, 2 }
  0x10   : > { %s2386_s24 = smov (%p33_p0, %s32_s24), 0  ;;  %s224_s28 = sand.u32 1, %s1685_s23  }
  0x11   : > { %2349 = sst [smem:[#allocation18_spill]] %s2386_s24  ;;  %p1764_p3 = por %p76_p2, %p75_p1 }
  0x12   : > { %s65_s27 = ssub.s32 %s1681_s22, %s2386_s24  ;;  %s1773_s29 = sand.u32 1, %s1673_s20  }
  0x13   : > { %p66_p4 = scmp.eq.s32.totalorder %s65_s27, 0  ;;  %s2340_s6 = sshll.u32 %s1773_s29, 7 }
  0x14   : > { %s1317_s7 = sshll.u32 %s1681_s22, 3  ;;  %s2352_s1 = sld [smem:[#allocation21_spill]] }
  0x15   : > { %s1776_s30 = scalar_select %p66_p4, %s1673_s20, %s68_s25  }
  0x16   : > { %s228_s11 = scalar_lea.vmem [#allocation6], %s2340_s6  ;;  %p1787_p6 = pnand %p1380_p5, %p1764_p3 }
  0x17   : > { %2351 = sst [smem:[#allocation19_spill]] %s1776_s30  ;;  %s236_s12 = sshll.u32 %s228_s11, 4  ;;  %s237_s12 = int_to_ptr.vmem [resolvable:$true] %s236_s12 }
  0x18   : > { %s1791_s15 = scalar_lea.sflag [#allocation7], %s224_s28  ;;  %s1687_s16 = smov 256  }
  0x19   : > { %s1688_s17 = smov 128   ;;  %s1689_s25 = smov 8  }
  0x1a   : > { %s233_s10 = scalar_lea.hbm %s2352_s1, %s1317_s7  ;;  %s1797_s27 = sadd.s32 4294967295, %s1685_s23  }
  0x1b   : > { %s234_s13 = sshll.u32 %s233_s10, 4  ;;  %p81_p7 = scmp.ne.s32.totalorder %s1669_s19, %s1665_s18  ;;  %s235_s13 = int_to_ptr.hbm [resolvable:$true] %s234_s13 }
  0x1c   : > { %1372 = dma.hbm_to_vmem [thread:$0]  (!%p1787_p6), %s235_s13, 2048, %s237_s12, %s1791_s15, %s1687_s16, %s1688_s17, %s1689_s25  }
  0x1d   : > { %p82_p8 = scmp.eq.s32.totalorder %s1797_s27, 0  ;;  %p1167_p9 = scmp.ge.s32.totalorder %s1685_s23, 1 }
  0x1e   : > { %p191_p10 = scmp.lt.s32.totalorder %s1685_s23, 3  ;;  %s2355_s0 = sld [smem:[#allocation20_spill]] }
  0x1f   : > { %p1806_p11 = por %p82_p8, %p81_p7  ;;  %s1173_s18 = sshll.u32 %s1773_s29, 1 }
  0x20   : > { %p1813_p12 = pnand %p1167_p9, %p191_p10  ;;  %s1690_s10 = smov [#allocation3]  }
  0x21   : > { %s207_s11 = sshll.u32 %s1690_s10, 4  ;;  %s1174_s12 = sshll.u32 %s1681_s22, 1  ;;  %s208_s11 = int_to_ptr.vmem [resolvable:$true] %s207_s11 }
  0x22   : > { %p1365_p13 = pneg %p1813_p12  ;;  %s254_s28 = scalar_lea.hbm %s2336_s2, %s1174_s12 }
  0x23   : > { %s250_s7 = scalar_lea.vmem [#allocation8], %s1173_s18  ;;  %s1318_s1 = sshll.u32 %s1681_s22, 7 }
  0x24   : > { %s205_s8 = sshll.u32 %s2355_s0, 4  ;;  %p1366_p0 = pnand %p1365_p13, %p82_p8  ;;  %s206_s8 = int_to_ptr.hbm [resolvable:$true] %s205_s8 }
  0x25   : > { %s258_s6 = sshll.u32 %s250_s7, 4  ;;  %s256_s0 = sshll.u32 %s254_s28, 4  ;;  %s257_s0 = int_to_ptr.hbm [resolvable:$true] %s256_s0  ;;  %s259_s6 = int_to_ptr.vmem [resolvable:$true] %s258_s6 }
  0x26   : > { %1368 = dma.hbm_to_vmem [thread:$0]  (!%p1366_p0), %s206_s8, 512, %s208_s11, [#allocation4], %s1688_s17, %s1688_s17, %s1689_s25  }
  0x27   : > { %1375 = dma.hbm_to_vmem [thread:$0]  (!%p1787_p6), %s257_s0, 32, %s259_s6, %s1791_s15  }
  0x28   : > { %s2357_s10 = sshll.u32 %s1773_s29, 7  ;;  %s274_s5 = scalar_lea.hbm %s2337_s3, %s1318_s1 }
  0x29   : > { %s269_s24 = scalar_lea.vmem [#allocation9], %s2357_s10  ;;  %s275_s13 = sshll.u32 %s274_s5, 4  ;;  %s276_s13 = int_to_ptr.hbm [resolvable:$true] %s275_s13 }
  0x2a   : > { %s277_s30 = sshll.u32 %s269_s24, 4  ;;  %s266_s18 = scalar_lea.sflag [#allocation10], %s1773_s29  ;;  %s278_s30 = int_to_ptr.vmem [resolvable:$true] %s277_s30 }
  0x2b   : > { %s1691_s12 = smov 64   ;;  %s1692_s16 = smov 4  }
  0x2c   : > { %1378 = dma.hbm_to_vmem [thread:$0]  (!%p1787_p6), %s276_s13, 2048, %s278_s30, %s266_s18, %s1691_s12, %s1691_s12, %s1692_s16  }
  0x2d   : > { %289 = sbr.rel (%p1813_p12) target bundleno = 492 (0x1ec), region = 40 }
  0x32   : > { %1648 = dma.done.wait (%p82_p8), [#allocation4], 512  }
  0x33   : > { %1650 = vsyncadd (%p82_p8), [#allocation4], 4294966784  ;;  %s296_s0 = sand.u32 1, %s1797_s27   ;;  %s298_s1 = sand.u32 1, %s1669_s19  }
  0x34   : > { %s1180_s5 = sshll.u32 %s298_s1, 7  ;;  %s297_s20 = scalar_lea.sflag [#allocation7], %s296_s0 }
  0x35   : > { %s1846_s23 = scalar_lea.vmem [#allocation6], %s1180_s5 }
  0x36   : > { %1652 = dma.done.wait (%p1806_p11), %s297_s20, 2080  }
  0x37   : > { %1654 = vsyncadd (%p1806_p11), %s297_s20, 4294965216  ;;  %s1181_s24 = sshll.u32 %s298_s1, 1  ;;  %s317_s30 = scalar_lea.sflag [#allocation10], %s298_s1 }
  0x38   : > { %s1852_s29 = scalar_lea.vmem [#allocation8], %s1181_s24  ;;  %s1854_s6 = scalar_lea.vmem [#allocation9], %s1180_s5 }
  0x39   : > { %1656 = dma.done.wait (%p1806_p11), %s317_s30, 2048  }
  0x3a   : > { %1658 = vsyncadd (%p1806_p11), %s317_s30, 4294965248  ;;  %p1183_p1 = scmp.ne.s32.totalorder %s1677_s21, 0 }
  0x3c   : > { %361 = sbr.rel (%p1183_p1) target bundleno = 70 (0x46), region = 60 }
  0x41   : > { %v1693_v0 = vmov 0.0  }
  0x42   : > { %362 = vst [vmem:[#allocation2 + $0x10] sm:$0xff] %v1693_v0 }
  0x43   : > { %363 = vst [vmem:[#allocation2] sm:$0xff] %v1693_v0 }
  0x44   : > { %364 = vst [vmem:[#allocation2 + $0x18] sm:$0xff] %v1693_v0 }
  0x45   : > { %365 = vst [vmem:[#allocation2 + $0x8] sm:$0xff] %v1693_v0 }
  0x46 PF: > { %v1242_v1 = vld [vmem:[%s1846_s23 + $0x70] sm:$0xf]  ;;  %v1334_v2 = vld [vmem:[%s1846_s23 + $0x74] sm:$0xf0]  ;;  %v1333_v3 = vld [vmem:[%s1846_s23 + $0x74] sm:$0xf] }
  0x47   : > { %v1243_v4 = vor.u32 %v1334_v2, %v1242_v1  ;;  %v1244_v5 = vld [vmem:[%s1846_s23 + $0x78] sm:$0xf0]  ;;  %v1234_v6 = vld [vmem:[%s1846_s23 + $0x60] sm:$0xf]  ;;  %v1332_v7 = vld [vmem:[%s1846_s23 + $0x64] sm:$0xf0] }
  0x48   : > { %v1247_v8 = vor.u32 %v1333_v3, %v1244_v5  ;;  %v1331_v9 = vld [vmem:[%s1846_s23 + $0x64] sm:$0xf]  ;;  %v1236_v10 = vld [vmem:[%s1846_s23 + $0x68] sm:$0xf0]  ;;  %v1235_v11 = vor.u32 %v1332_v7, %v1234_v6  ;;  %v1226_v13 = vld [vmem:[%s1846_s23 + $0x50] sm:$0xf] }
  0x49   : > { %474 = vmatpush.bf16.msra.mxu0 %v1243_v4  ;;  %v1239_v12 = vor.u32 %v1331_v9, %v1236_v10  ;;  %v1330_v14 = vld [vmem:[%s1846_s23 + $0x54] sm:$0xf0]  ;;  %v1329_v15 = vld [vmem:[%s1846_s23 + $0x54] sm:$0xf]  ;;  %v1228_v16 = vld [vmem:[%s1846_s23 + $0x58] sm:$0xf0] }
  0x4a   : > { %493 = vmatpush.bf16.msra.mxu1 %v1247_v8  ;;  %v1227_v17 = vor.u32 %v1330_v14, %v1226_v13  ;;  %v1231_v18 = vor.u32 %v1329_v15, %v1228_v16  ;;  %v1218_v19 = vld [vmem:[%s1846_s23 + $0x40] sm:$0xf]  ;;  %v1328_v20 = vld [vmem:[%s1846_s23 + $0x44] sm:$0xf0]  ;;  %v1327_v21 = vld [vmem:[%s1846_s23 + $0x44] sm:$0xf] }
  0x4b   : > { %v1220_v22 = vld [vmem:[%s1846_s23 + $0x48] sm:$0xf0]  ;;  %v1219_v23 = vor.u32 %v1328_v20, %v1218_v19  ;;  %v1210_v25 = vld [vmem:[%s1846_s23 + $0x30] sm:$0xf]  ;;  %v1326_v26 = vld [vmem:[%s1846_s23 + $0x34] sm:$0xf0] }
  0x4c   : > { %v1223_v24 = vor.u32 %v1327_v21, %v1220_v22  ;;  %v1325_v27 = vld [vmem:[%s1846_s23 + $0x34] sm:$0xf]  ;;  %v1212_v28 = vld [vmem:[%s1846_s23 + $0x38] sm:$0xf0]  ;;  %v1211_v29 = vor.u32 %v1326_v26, %v1210_v25  ;;  %v1202_v31 = vld [vmem:[%s1846_s23 + $0x20] sm:$0xf] }
  0x4d   : > { %475 = vmatpush.bf16.msra.mxu0 %v1235_v11  ;;  %v1215_v30 = vor.u32 %v1325_v27, %v1212_v28  ;;  %v1324_v32 = vld [vmem:[%s1846_s23 + $0x24] sm:$0xf0]  ;;  %v1323_v33 = vld [vmem:[%s1846_s23 + $0x24] sm:$0xf]  ;;  %v1204_v34 = vld [vmem:[%s1846_s23 + $0x28] sm:$0xf0] }
  0x4e   : > { %494 = vmatpush.bf16.msra.mxu1 %v1239_v12  ;;  %v1203_v35 = vor.u32 %v1324_v32, %v1202_v31  ;;  %v1207_v36 = vor.u32 %v1323_v33, %v1204_v34  ;;  %v1194_v37 = vld [vmem:[%s1846_s23 + $0x10] sm:$0xf]  ;;  %v1322_v38 = vld [vmem:[%s1846_s23 + $0x14] sm:$0xf0]  ;;  %v1321_v39 = vld [vmem:[%s1846_s23 + $0x14] sm:$0xf] }
  0x4f   : > { %v1196_v40 = vld [vmem:[%s1846_s23 + $0x18] sm:$0xf0]  ;;  %v1195_v41 = vor.u32 %v1322_v38, %v1194_v37  ;;  %v1186_v43 = vld [vmem:[%s1846_s23] sm:$0xf]  ;;  %v1320_v44 = vld [vmem:[%s1846_s23 + $0x4] sm:$0xf0] }
  0x50   : > { %v1199_v42 = vor.u32 %v1321_v39, %v1196_v40  ;;  %v1319_v45 = vld [vmem:[%s1846_s23 + $0x4] sm:$0xf]  ;;  %v1188_v46 = vld [vmem:[%s1846_s23 + $0x8] sm:$0xf0]  ;;  %v1187_v47 = vor.u32 %v1320_v44, %v1186_v43  ;;  %v368_v52 = vld [vmem:[#allocation3 + $0x10] sm:$0xff]  ;;  %p1312_p2 = scmp.ne.s32.totalorder %s1677_s21, 1 }
  0x51   : > { %476 = vmatpush.bf16.msra.mxu0 %v1227_v17  ;;  %v366_v48 = vld [vmem:[#allocation3] sm:$0xff]  ;;  %v367_v49 = vld [vmem:[#allocation3 + $0x8] sm:$0xff]  ;;  %v1191_v50 = vor.u32 %v1319_v45, %v1188_v46  ;;  %v369_v53 = vld [vmem:[#allocation3 + $0x18] sm:$0xff] }
  0x52   : > { %495 = vmatpush.bf16.msra.mxu1 %v1231_v18  ;;  %v370_v51 = vpack.c.bf16 %v367_v49, %v366_v48  ;;  %v371_v54 = vpack.c.bf16 %v369_v53, %v368_v52  ;;  %v388_v55 = vld [vmem:[%s1852_s29] sm:$0x3]  ;;  %v1341_v21 = vld [vmem:[%s1854_s6 + $0x30] sm:$0xff]  ;;  %v1339_v48 = vld [vmem:[%s1854_s6 + $0x20] sm:$0xff] }
  0x53   : > { %v1894_v56 = vperm.slane %v388_v55, 0  ;;  %v1896_v57 = vperm.slane %v388_v55, 1  ;;  %v1342_v11 = vld [vmem:[%s1854_s6 + $0x38] sm:$0xff]  ;;  %v1349_v22 = vld [vmem:[%s1854_s6 + $0x70] sm:$0xff]  ;;  %v1347_v49 = vld [vmem:[%s1854_s6 + $0x60] sm:$0xff] }
  0x54   : > { %v1350_v12 = vld [vmem:[%s1854_s6 + $0x78] sm:$0xff]  ;;  %968 = vmatpush.bf16.msra.mxu2 %v1342_v11 }
  0x55   : > { %477 = vmatpush.bf16.msra.mxu0 %v1219_v23  ;;  %987 = vmatpush.bf16.msra.mxu3 %v1350_v12 }
  0x56   : > { %496 = vmatpush.bf16.msra.mxu1 %v1223_v24 }
  0x58   : > { %969 = vmatpush.bf16.msra.mxu2 %v1341_v21 }
  0x59   : > { %478 = vmatpush.bf16.msra.mxu0 %v1211_v29  ;;  %988 = vmatpush.bf16.msra.mxu3 %v1349_v22 }
  0x5a   : > { %497 = vmatpush.bf16.msra.mxu1 %v1215_v30 }
  0x5d   : > { %479 = vmatpush.bf16.msra.mxu0 %v1203_v35  ;;  %v1340_v35 = vld [vmem:[%s1854_s6 + $0x28] sm:$0xff] }
  0x5e   : > { %498 = vmatpush.bf16.msra.mxu1 %v1207_v36  ;;  %v1348_v36 = vld [vmem:[%s1854_s6 + $0x68] sm:$0xff]  ;;  %970 = vmatpush.bf16.msra.mxu2 %v1340_v35 }
  0x5f   : > { %989 = vmatpush.bf16.msra.mxu3 %v1348_v36 }
  0x61   : > { %480 = vmatpush.bf16.msra.mxu0 %v1195_v41 }
  0x62   : > { %499 = vmatpush.bf16.msra.mxu1 %v1199_v42  ;;  %971 = vmatpush.bf16.msra.mxu2 %v1339_v48 }
  0x63   : > { %990 = vmatpush.bf16.msra.mxu3 %v1347_v49 }
  0x65   : > { %481 = vmatpush.bf16.msra.mxu0 %v1187_v47 }
  0x66   : > { %500 = vmatpush.bf16.msra.mxu1 %v1191_v50 }
  0x68   : > { %482 = vmatmul.bf16.vlgmr.msra.gmra.mxu0 %v370_v51 }
  0x69   : > { %501 = vmatmul.bf16.vlgmr.msra.gmra.mxu1 %v370_v51 }
  0x78   : > { %487 = vmatmul.bf16.gmra.mxu0 %v371_v54 }
  0x79   : > { %506 = vmatmul.bf16.gmra.mxu1 %v371_v54 }
  0xe5   : > { %v483_v58 = vpop.f32.mrf.mxu0 }
  0xe6   : > { %v484_v59 = vadd.f32 %v483_v58, %v1894_v56  ;;  %v502_v60 = vpop.f32.mrf.mxu1 }
  0xe7   : > { %v1900_v61 = vadd.f32 %v502_v60, %v1896_v57 }
  0xe8   : > { %v1902_v62 = vmul.f32 0.70710677, %v484_v59  ;;  %v1951_v37 = vmul.f32 0.5, %v484_v59 }
  0xe9   : > { %v1905_v63 = vmul.f32 0.70710677, %v1900_v61 }
  0xea   : > { %v528_v0 = vand.u32 2147483647, %v1902_v62 }
  0xeb   : > { %v529_v1 = vand.u32 2147483647, %v1905_v63 }
  0xec   : > { %v536_v2 = vmul.f32 0.3275911, %v528_v0  ;;  %v744_v13 = vsub.f32 0.0, %v528_v0 }
  0xed   : > { %v537_v3 = vmul.f32 0.3275911, %v529_v1  ;;  %v485_v4 = vpop.f32.mrf.mxu0  ;;  %v745_v15 = vsub.f32 0.0, %v529_v1 }
  0xee   : > { %v1909_v5 = vadd.f32 1.0, %v536_v2  ;;  %v486_v6 = vadd.f32 %v485_v4, %v1894_v56  ;;  %v504_v7 = vpop.f32.mrf.mxu1  ;;  %v752_v23 = vmul.f32 %v744_v13, %v528_v0  ;;  %v1346_v2 = vld [vmem:[%s1854_s6 + $0x58] sm:$0xff] }
  0xef   : > { %v1912_v8 = vadd.f32 1.0, %v537_v3  ;;  %v1915_v9 = vadd.f32 %v504_v7, %v1896_v57  ;;  %v753_v27 = vmul.f32 %v745_v15, %v529_v1  ;;  %991 = vmatpush.bf16.msra.mxu3 %v1346_v2 }
  0xf0   : > { %1442 = vrcp.f32 %v1909_v5  ;;  %v1918_v10 = vmul.f32 0.70710677, %v486_v6  ;;  %v563_v26 = vand.u32 2147483648, %v1909_v5  ;;  %v760_v38 = vmul.f32 1.442695, %v752_v23 }
  0xf1   : > { %1444 = vrcp.f32 %v1912_v8  ;;  %v1924_v14 = vmul.f32 0.70710677, %v1915_v9  ;;  %v578_v31 = vand.u32 2147483648, %v1912_v8  ;;  %v762_v42 = vmul.f32 1.442695, %v753_v27 }
  0xf2   : > { %v530_v16 = vand.u32 2147483647, %v1918_v10  ;;  %v1954_v40 = vor.u32 1.1754944e-38, %v563_v26  ;;  %v1960_v44 = vmul.f32 0.5, %v486_v6  ;;  %vm557_vm0 = vweird.f32 %v1909_v5  ;;  %v1345_v26 = vld [vmem:[%s1854_s6 + $0x50] sm:$0xff] }
  0xf3   : > { %v1928_v17 = vand.u32 2147483647, %v1924_v14  ;;  %v1958_v43 = vor.u32 1.1754944e-38, %v578_v31  ;;  %v561_v53 = vand.u32 2147483647, %v1909_v5  ;;  %vm572_vm6 = vweird.f32 %v1912_v8  ;;  %992 = vmatpush.bf16.msra.mxu3 %v1345_v26 }
  0xf4   : > { %v538_v20 = vmul.f32 0.3275911, %v530_v16  ;;  %v746_v34 = vsub.f32 0.0, %v530_v16  ;;  %v576_v58 = vand.u32 2147483647, %v1912_v8 }
  0xf5   : > { %v488_v18 = vpop.f32.mrf.mxu0  ;;  %v539_v24 = vmul.f32 0.3275911, %v1928_v17  ;;  %v747_v51 = vsub.f32 0.0, %v1928_v17  ;;  %vm2004_vm2 = vcmp.eq.f32.partialorder %v561_v53, 8.507059e+37  ;;  %v1336_v53 = vld [vmem:[%s1854_s6 + $0x8] sm:$0xff] }
  0xf6   : > { %v1930_v19 = vpop.eup %1442  ;;  %v1938_v28 = vadd.f32 1.0, %v538_v20  ;;  %v507_v29 = vpop.f32.mrf.mxu1  ;;  %v1946_v33 = vadd.f32 %v488_v18, %v1894_v56  ;;  %v754_v50 = vmul.f32 %v746_v34, %v530_v16 }
  0xf7   : > { %v553_v25 = vmul.f32 %v1930_v19, %v1909_v5  ;;  %v1940_v30 = vpop.eup %1444  ;;  %v1943_v32 = vadd.f32 1.0, %v539_v24  ;;  %v1966_v46 = vadd.f32 %v507_v29, %v1896_v57  ;;  %vm558_vm1 = vweird.f32 %v1930_v19  ;;  %v1344_v5 = vld [vmem:[%s1854_s6 + $0x48] sm:$0xff] }
  0xf8   : > { %1446 = vrcp.f32 %v1938_v28  ;;  %v568_v41 = vmul.f32 %v1940_v30, %v1912_v8  ;;  %v1963_v45 = vmul.f32 0.70710677, %v1946_v33  ;;  %v593_v6 = vand.u32 2147483648, %v1938_v28  ;;  %vm2033_vm5 = vmor %vm557_vm0, %vm558_vm1  ;;  %993 = vmatpush.bf16.msra.mxu3 %v1344_v5 }
  0xf9   : > { %1448 = vrcp.f32 %v1943_v32  ;;  %v554_v39 = vsub.f32 1.0, %v553_v25  ;;  %v1978_v55 = vmul.f32 0.70710677, %v1966_v46  ;;  %v764_v11 = vmul.f32 1.442695, %v754_v50  ;;  %v1337_v25 = vld [vmem:[%s1854_s6 + $0x10] sm:$0xff] }
  0xfa   : > { %1450 = vpow2.f32 %v760_v38  ;;  %v532_v54 = vand.u32 2147483647, %v1963_v45  ;;  %v569_v0 = vsub.f32 1.0, %v568_v41  ;;  %v755_v12 = vmul.f32 %v747_v51, %v1928_v17 }
  0xfb   : > { %v555_v60 = vmul.f32 %v1930_v19, %v554_v39  ;;  %1452 = vpow2.f32 %v762_v42  ;;  %v1997_v15 = vand.u32 2147483647, %v1978_v55  ;;  %vm587_vm3 = vweird.f32 %v1938_v28 }
  0xfc   : > { %v540_v7 = vmul.f32 0.3275911, %v532_v54  ;;  %v748_v13 = vsub.f32 0.0, %v532_v54  ;;  %v2009_v24 = vmul.f32 %v1940_v30, %v569_v0  ;;  %vm573_vm4 = vweird.f32 %v1940_v30 }
  0xfd   : > { %v490_v47 = vpop.f32.mrf.mxu0  ;;  %v541_v17 = vmul.f32 0.3275911, %v1997_v15  ;;  %v556_v27 = vadd.f32 %v1930_v19, %v555_v60  ;;  %v594_v31 = vor.u32 1.1754944e-38, %v593_v6  ;;  %v608_v34 = vand.u32 2147483648, %v1943_v32  ;;  %vm2109_vm12 = vmor %vm572_vm6, %vm573_vm4 }
  0xfe   : > { %v1973_v52 = vadd.f32 %v490_v47, %v1894_v56  ;;  %v1981_v59 = vpop.eup %1446  ;;  %v1338_v56 = vld [vmem:[%s1854_s6 + $0x18] sm:$0xff]  ;;  %v509_v16 = vpop.f32.mrf.mxu1  ;;  %v2001_v21 = vadd.f32 1.0, %v540_v7  ;;  %v766_v39 = vmul.f32 1.442695, %v755_v12  ;;  %v756_v41 = vmul.f32 %v748_v13, %v532_v54 }
  0xff   : > { %v1989_v3 = vpop.eup %1448  ;;  %v583_v4 = vmul.f32 %v1981_v59, %v1938_v28  ;;  %972 = vmatpush.bf16.msra.mxu2 %v1338_v56  ;;  %v2022_v35 = vadd.f32 %v509_v16, %v1896_v57  ;;  %v2027_v42 = vadd.f32 1.0, %v541_v17  ;;  %v591_v49 = vand.u32 2147483647, %v1938_v28  ;;  %v1343_v17 = vld [vmem:[%s1854_s6 + $0x40] sm:$0xff] }
 0x100   : > { %v1985_v1 = vmul.f32 0.70710677, %v1973_v52  ;;  %v598_v20 = vmul.f32 %v1989_v3, %v1943_v32  ;;  %v2016_v29 = vpop.eup %1450  ;;  %1454 = vrcp.f32 %v2001_v21  ;;  %vm588_vm7 = vweird.f32 %v1981_v59  ;;  %994 = vmatpush.bf16.msra.mxu3 %v1343_v17 }
 0x101   : > { %v584_v18 = vsub.f32 1.0, %v583_v4  ;;  %v2024_v36 = vpop.eup %1452  ;;  %1456 = vpow2.f32 %v764_v11  ;;  %v749_v50 = vsub.f32 0.0, %v1997_v15  ;;  %v560_v54 = vsel %vm2033_vm5, %v1930_v19, %v556_v27  ;;  %vm2066_vm9 = vmor %vm587_vm3, %vm588_vm7 }
 0x102   : > { %v534_v22 = vand.u32 2147483647, %v1985_v1  ;;  %v599_v57 = vsub.f32 1.0, %v598_v20  ;;  %v623_v60 = vand.u32 2147483648, %v2001_v21  ;;  %1458 = vrcp.f32 %v2027_v42  ;;  %v1335_v20 = vld [vmem:[%s1854_s6] sm:$0xff] }
 0x103   : > { %v585_v38 = vmul.f32 %v1981_v59, %v584_v18  ;;  %973 = vmatpush.bf16.msra.mxu2 %v1337_v25  ;;  %v2051_v56 = vmul.f32 0.70710677, %v2022_v35  ;;  %v2053_v2 = vor.u32 1.1754944e-38, %v608_v34  ;;  %1460 = vpow2.f32 %v766_v39 }
 0x104   : > { %v542_v48 = vmul.f32 0.3275911, %v534_v22  ;;  %v750_v51 = vsub.f32 0.0, %v534_v22  ;;  %v768_v4 = vmul.f32 1.442695, %v756_v41  ;;  %v600_v19 = vmul.f32 %v1989_v3, %v599_v57 }
 0x105   : > { %v586_v6 = vadd.f32 %v1981_v59, %v585_v38  ;;  %vm603_vm8 = vweird.f32 %v1989_v3  ;;  %v638_v11 = vand.u32 2147483648, %v2027_v42  ;;  %v2073_v18 = vand.u32 2147483647, %v2051_v56 }
 0x106   : > { %v2048_v0 = vadd.f32 1.0, %v542_v48  ;;  %v2056_v7 = vpop.eup %1454  ;;  %v758_v16 = vmul.f32 %v750_v51, %v534_v22  ;;  %v2080_v25 = vsel %vm2004_vm2, %v1954_v40, %v560_v54  ;;  %vm602_vm10 = vweird.f32 %v1943_v32 }
 0x107   : > { %v613_v13 = vmul.f32 %v2056_v7, %v2001_v21  ;;  %974 = vmatpush.bf16.msra.mxu2 %v1336_v53  ;;  %v2082_v28 = vpop.eup %1456  ;;  %v2085_v26 = vor.u32 1.1754944e-38, %v623_v60  ;;  %v2088_v22 = vmul.f32 %v749_v50, %v1997_v15  ;;  %v590_v27 = vsel %vm2066_vm9, %v1981_v59, %v586_v6  ;;  %vm2154_vm3 = vmor %vm602_vm10, %vm603_vm8 }
 0x108   : > { %1462 = vrcp.f32 %v2048_v0  ;;  %vm592_vm11 = vcmp.eq.f32.partialorder %v591_v49, 8.507059e+37  ;;  %v653_v34 = vand.u32 2147483648, %v2048_v0  ;;  %v543_v40 = vmul.f32 0.3275911, %v2073_v18  ;;  %v2097_v38 = vpop.eup %1458 }
 0x109   : > { %1464 = vpow2.f32 %v768_v4  ;;  %v2095_v23 = vsel %vm592_vm11, %v594_v31, %v590_v27  ;;  %v614_v39 = vsub.f32 1.0, %v613_v13  ;;  %v672_v41 = vmul.f32 1.0614054, %v2080_v25  ;;  %v2103_v57 = vpop.eup %1460 }
 0x10a   : > { %v674_v15 = vmul.f32 1.0614054, %v2095_v23  ;;  %v571_v47 = vadd.f32 %v1940_v30, %v2009_v24  ;;  %vm617_vm13 = vweird.f32 %v2001_v21  ;;  %v628_v31 = vmul.f32 %v2097_v38, %v2027_v42 }
 0x10b   : > { %v2116_v48 = vor.u32 1.1754944e-38, %v638_v11  ;;  %v2118_v49 = vmul.f32 1.442695, %v758_v16  ;;  %v2120_v24 = vadd.f32 1.0, %v543_v40  ;;  %975 = vmatpush.bf16.msra.mxu2 %v1335_v20  ;;  %vm618_vm14 = vweird.f32 %v2056_v7 }
 0x10c   : > { %vm647_vm15 = vweird.f32 %v2048_v0  ;;  %v680_v51 = vadd.f32 -1.4531521, %v672_v41  ;;  %v682_v53 = vadd.f32 -1.4531521, %v674_v15  ;;  %v575_v5 = vsel %vm2109_vm12, %v1940_v30, %v571_v47  ;;  %vm2176_vm6 = vmor %vm617_vm13, %vm618_vm14 }
 0x10d   : > { %v629_v54 = vsub.f32 1.0, %v628_v31  ;;  %v2131_v4 = vor.u32 1.1754944e-38, %v653_v34  ;;  %1466 = vrcp.f32 %v2120_v24  ;;  %v615_v6 = vmul.f32 %v2056_v7, %v614_v39 }
 0x10e   : > { %v2122_v50 = vpop.eup %1462  ;;  %v751_v11 = vsub.f32 0.0, %v2073_v18  ;;  %v688_v12 = vmul.f32 %v680_v51, %v2080_v25  ;;  %vm577_vm0 = vcmp.eq.f32.partialorder %v576_v58, 8.507059e+37  ;;  %v690_v16 = vmul.f32 %v682_v53, %v2095_v23 }
 0x10f   : > { %v643_v60 = vmul.f32 %v2122_v50, %v2048_v0  ;;  %v2139_v13 = vpop.eup %1464  ;;  %vm648_vm1 = vweird.f32 %v2122_v50  ;;  %v2144_v20 = vsel %vm577_vm0, %v1958_v43, %v575_v5  ;;  %v630_v17 = vmul.f32 %v2097_v38, %v629_v54 }
 0x110   : > { %vm633_vm2 = vweird.f32 %v2097_v38  ;;  %v668_v27 = vand.u32 2147483648, %v2120_v24  ;;  %v696_v34 = vadd.f32 1.4214138, %v688_v12  ;;  %v601_v8 = vadd.f32 %v1989_v3, %v600_v19  ;;  %vm2191_vm7 = vmor %vm647_vm15, %vm648_vm1 }
 0x111   : > { %v644_v30 = vsub.f32 1.0, %v643_v60  ;;  %v698_v40 = vadd.f32 1.4214138, %v690_v16  ;;  %v606_v39 = vand.u32 2147483647, %v1943_v32  ;;  %vm632_vm4 = vweird.f32 %v2027_v42 }
 0x112   : > { %v673_v41 = vmul.f32 1.0614054, %v2144_v20  ;;  %v704_v15 = vmul.f32 %v696_v34, %v2080_v25  ;;  %v605_v19 = vsel %vm2154_vm3, %v1989_v3, %v601_v8  ;;  %v616_v47 = vadd.f32 %v2056_v7, %v615_v6  ;;  %vm2224_vm14 = vmor %vm632_vm4, %vm633_vm2 }
 0x113   : > { %v645_v43 = vmul.f32 %v2122_v50, %v644_v30  ;;  %v621_v59 = vand.u32 2147483647, %v2001_v21  ;;  %v2168_v31 = vpop.eup %1466  ;;  %v706_v51 = vmul.f32 %v698_v40, %v2095_v23  ;;  %vm607_vm5 = vcmp.eq.f32.partialorder %v606_v39, 8.507059e+37 }
 0x114   : > { %v681_v32 = vadd.f32 -1.4531521, %v673_v41  ;;  %v658_v3 = vmul.f32 %v2168_v31, %v2120_v24  ;;  %v2182_v54 = vor.u32 1.1754944e-38, %v668_v27  ;;  %v712_v60 = vadd.f32 -0.28449672, %v704_v15 }
 0x115   : > { %v646_v53 = vadd.f32 %v2122_v50, %v645_v43  ;;  %v2185_v6 = vsel %vm607_vm5, %v2053_v2, %v605_v19  ;;  %vm663_vm8 = vweird.f32 %v2168_v31  ;;  %v714_v21 = vadd.f32 -0.28449672, %v706_v51 }
 0x116   : > { %v675_v30 = vmul.f32 1.0614054, %v2185_v6  ;;  %v689_v16 = vmul.f32 %v681_v32, %v2144_v20  ;;  %v620_v2 = vsel %vm2176_vm6, %v2056_v7, %v616_v47  ;;  %v659_v27 = vsub.f32 1.0, %v658_v3 }
 0x117   : > { %v720_v34 = vmul.f32 %v712_v60, %v2080_v25  ;;  %vm622_vm9 = vcmp.eq.f32.partialorder %v621_v59, 8.507059e+37  ;;  %v650_v8 = vsel %vm2191_vm7, %v2122_v50, %v646_v53  ;;  %vm662_vm10 = vweird.f32 %v2120_v24 }
 0x118   : > { %v722_v58 = vmul.f32 %v714_v21, %v2095_v23  ;;  %v683_v43 = vadd.f32 -1.4531521, %v675_v30  ;;  %v697_v40 = vadd.f32 1.4214138, %v689_v16  ;;  %v2208_v39 = vsel %vm622_vm9, %v2085_v26, %v620_v2  ;;  %vm2250_vm1 = vmor %vm662_vm10, %vm663_vm8 }
 0x119   : > { %v660_v41 = vmul.f32 %v2168_v31, %v659_v27  ;;  %v728_v7 = vadd.f32 0.2548296, %v720_v34  ;;  %v651_v15 = vand.u32 2147483647, %v2048_v0  ;;  %v676_v19 = vmul.f32 1.0614054, %v2208_v39 }
 0x11a   : > { %vm792_vm11 = vcmp.ge.f32.partialorder %v1902_v62, 0.0  ;;  %v730_v47 = vadd.f32 0.2548296, %v722_v58  ;;  %v691_v50 = vmul.f32 %v683_v43, %v2185_v6  ;;  %v705_v59 = vmul.f32 %v697_v40, %v2144_v20 }
 0x11b   : > { %v631_v51 = vadd.f32 %v2097_v38, %v630_v17  ;;  %vm794_vm12 = vcmp.ge.f32.partialorder %v1918_v10, 0.0  ;;  %v736_v26 = vmul.f32 %v728_v7, %v2080_v25  ;;  %vm652_vm13 = vcmp.eq.f32.partialorder %v651_v15, 8.507059e+37 }
 0x11c   : > { %v684_v32 = vadd.f32 -1.4531521, %v676_v19  ;;  %v636_v53 = vand.u32 2147483647, %v2027_v42  ;;  %v738_v5 = vmul.f32 %v730_v47, %v2095_v23  ;;  %v699_v3 = vadd.f32 1.4214138, %v691_v50 }
 0x11d   : > { %v713_v17 = vadd.f32 -0.28449672, %v705_v59  ;;  %v2230_v60 = vsel %vm652_vm13, %v2131_v4, %v650_v8  ;;  %v776_v25 = vmul.f32 %v2016_v29, %v736_v26  ;;  %v635_v42 = vsel %vm2224_vm14, %v2097_v38, %v631_v51 }
 0x11e   : > { %v678_v12 = vmul.f32 1.0614054, %v2230_v60  ;;  %v692_v21 = vmul.f32 %v684_v32, %v2208_v39  ;;  %v778_v30 = vmul.f32 %v2082_v28, %v738_v5  ;;  %v707_v16 = vmul.f32 %v699_v3, %v2185_v6 }
 0x11f   : > { %v721_v23 = vmul.f32 %v713_v17, %v2144_v20  ;;  %vm637_vm15 = vcmp.eq.f32.partialorder %v636_v53, 8.507059e+37  ;;  %v784_v2 = vsub.f32 1.0, %v776_v25  ;;  %v661_v43 = vadd.f32 %v2168_v31, %v660_v41 }
 0x120   : > { %v686_v4 = vadd.f32 -1.4531521, %v678_v12  ;;  %v700_v27 = vadd.f32 1.4214138, %v692_v21  ;;  %v2242_v29 = vsel %vm637_vm15, %v2116_v48, %v635_v42  ;;  %v786_v34 = vsub.f32 1.0, %v778_v30 }
 0x121   : > { %v715_v8 = vadd.f32 -0.28449672, %v707_v16  ;;  %v729_v58 = vadd.f32 0.2548296, %v721_v23  ;;  %vm793_vm0 = vcmp.ge.f32.partialorder %v1905_v63, 0.0  ;;  %v800_v38 = vsub.f32 0.0, %v784_v2 }
 0x122   : > { %v694_v40 = vmul.f32 %v686_v4, %v2230_v60  ;;  %v708_v48 = vmul.f32 %v700_v27, %v2208_v39  ;;  %v666_v7 = vand.u32 2147483647, %v2120_v24  ;;  %v802_v15 = vsub.f32 0.0, %v786_v34 }
 0x123   : > { %v723_v41 = vmul.f32 %v715_v8, %v2185_v6  ;;  %v737_v19 = vmul.f32 %v729_v58, %v2144_v20  ;;  %v665_v47 = vsel %vm2250_vm1, %v2168_v31, %v661_v43  ;;  %v808_v50 = vsel %vm792_vm11, %v784_v2, %v800_v38 }
 0x124   : > { %v702_v59 = vadd.f32 1.4214138, %v694_v40  ;;  %v716_v51 = vadd.f32 -0.28449672, %v708_v48  ;;  %vm667_vm2 = vcmp.eq.f32.partialorder %v666_v7, 8.507059e+37  ;;  %v810_v26 = vsel %vm794_vm12, %v786_v34, %v802_v15 }
 0x125   : > { %v816_v32 = vadd.f32 1.0, %v808_v50  ;;  %v731_v24 = vadd.f32 0.2548296, %v723_v41  ;;  %v777_v53 = vmul.f32 %v2024_v36, %v737_v19  ;;  %v818_v0 = vadd.f32 1.0, %v810_v26 }
 0x126   : > { %v710_v20 = vmul.f32 %v702_v59, %v2230_v60  ;;  %v724_v5 = vmul.f32 %v716_v51, %v2208_v39  ;;  %v2270_v31 = vsel %vm667_vm2, %v2182_v54, %v665_v47  ;;  %v677_v10 = vmul.f32 1.0614054, %v2242_v29 }
 0x127   : > { %v824_v62 = vmul.f32 %v816_v32, %v1951_v37  ;;  %v739_v3 = vmul.f32 %v731_v24, %v2185_v6  ;;  %v785_v17 = vsub.f32 1.0, %v777_v53  ;;  %v826_v25 = vmul.f32 %v818_v0, %v1960_v44 }
 0x128   : > { %v718_v12 = vadd.f32 -0.28449672, %v710_v20  ;;  %v732_v21 = vadd.f32 0.2548296, %v724_v5  ;;  %v679_v36 = vmul.f32 1.0614054, %v2270_v31  ;;  %1468 = vpow2.f32 %v2118_v49 }
 0x129   : > { %v779_v42 = vmul.f32 %v2103_v57, %v739_v3  ;;  %v801_v30 = vsub.f32 0.0, %v785_v17  ;;  %v685_v54 = vadd.f32 -1.4531521, %v677_v10  ;;  %v836_v16 = vpack.c.bf16 %v826_v25, %v824_v62 }
 0x12a   : > { %v726_v37 = vmul.f32 %v718_v12, %v2230_v60  ;;  %v740_v6 = vmul.f32 %v732_v21, %v2208_v39  ;;  %v687_v23 = vadd.f32 -1.4531521, %v679_v36  ;;  %v759_v44 = vmul.f32 %v751_v11, %v2073_v18 }
 0x12b   : > { %v787_v2 = vsub.f32 1.0, %v779_v42  ;;  %v809_v4 = vsel %vm793_vm0, %v785_v17, %v801_v30  ;;  %v693_v49 = vmul.f32 %v685_v54, %v2242_v29  ;;  %v513_v57 = vmul.f32 0.5, %v1900_v61  ;;  %976 = vmatmul.bf16.vlgmr.msra.gmra.mxu2 %v836_v16 }
 0x12c   : > { %v734_v27 = vadd.f32 0.2548296, %v726_v37  ;;  %v780_v34 = vmul.f32 %v2139_v13, %v740_v6  ;;  %v695_v8 = vmul.f32 %v687_v23, %v2270_v31  ;;  %v770_v39 = vmul.f32 1.442695, %v2088_v22 }
 0x12d   : > { %v803_v58 = vsub.f32 0.0, %v787_v2  ;;  %v817_v43 = vadd.f32 1.0, %v809_v4  ;;  %v701_v28 = vadd.f32 1.4214138, %v693_v49  ;;  %vm795_vm3 = vcmp.ge.f32.partialorder %v1924_v14, 0.0 }
 0x12e   : > { %v742_v63 = vmul.f32 %v734_v27, %v2230_v60  ;;  %v788_v18 = vsub.f32 1.0, %v780_v34  ;;  %v703_v11 = vadd.f32 1.4214138, %v695_v8  ;;  %v1469_v38 = vpop.eup %1468  ;;  %v515_v61 = vmul.f32 0.5, %v1915_v9 }
 0x12f   : > { %v774_v40 = vmul.f32 1.442695, %v759_v44  ;;  %v811_v48 = vsel %vm795_vm3, %v787_v2, %v803_v58  ;;  %v709_v13 = vmul.f32 %v701_v28, %v2242_v29  ;;  %vm796_vm4 = vcmp.ge.f32.partialorder %v1963_v45, 0.0  ;;  %v834_v28 = vld [vmem:[#allocation2 + $0x18] sm:$0xff] }
 0x130   : > { %v819_v7 = vadd.f32 1.0, %v811_v48  ;;  %v782_v15 = vmul.f32 %v1469_v38, %v742_v63  ;;  %v804_v41 = vsub.f32 0.0, %v788_v18  ;;  %v711_v22 = vmul.f32 %v703_v11, %v2270_v31  ;;  %v835_v38 = vld [vmem:[#allocation2 + $0x8] sm:$0xff] }
 0x131   : > { %1470 = vpow2.f32 %v770_v39  ;;  %v825_v14 = vmul.f32 %v817_v43, %v513_v57  ;;  %v717_v19 = vadd.f32 -0.28449672, %v709_v13  ;;  %vm798_vm5 = vcmp.ge.f32.partialorder %v1985_v1, 0.0  ;;  %v832_v57 = vld [vmem:[#allocation2 + $0x10] sm:$0xff] }
 0x132   : > { %v827_v60 = vmul.f32 %v819_v7, %v515_v61  ;;  %v790_v47 = vsub.f32 1.0, %v782_v15  ;;  %v812_v50 = vsel %vm796_vm4, %v788_v18, %v804_v41  ;;  %v719_v59 = vadd.f32 -0.28449672, %v711_v22 }
 0x133   : > { %1472 = vpow2.f32 %v774_v40  ;;  %v725_v9 = vmul.f32 %v717_v19, %v2242_v29  ;;  %v820_v24 = vadd.f32 1.0, %v812_v50  ;;  %v516_v5 = vmul.f32 0.5, %v1946_v33 }
 0x134   : > { %v837_v51 = vpack.c.bf16 %v827_v60, %v825_v14  ;;  %v806_v26 = vsub.f32 0.0, %v790_v47  ;;  %v727_v32 = vmul.f32 %v719_v59, %v2270_v31  ;;  %v518_v62 = vmul.f32 0.5, %v1973_v52 }
 0x135   : > { %v733_v53 = vadd.f32 0.2548296, %v725_v9  ;;  %v828_v12 = vmul.f32 %v820_v24, %v516_v5  ;;  %vm797_vm6 = vcmp.ge.f32.partialorder %v1978_v55, 0.0  ;;  %vm799_vm7 = vcmp.ge.f32.partialorder %v2051_v56, 0.0  ;;  %v833_v56 = vld [vmem:[#allocation2] sm:$0xff] }
 0x136   : > { %995 = vmatmul.bf16.vlgmr.msra.gmra.mxu3 %v837_v51  ;;  %v814_v45 = vsel %vm798_vm5, %v790_v47, %v806_v26  ;;  %v735_v0 = vadd.f32 0.2548296, %v727_v32  ;;  %v519_v6 = vmul.f32 0.5, %v2022_v35 }
 0x137   : > { %v1471_v20 = vpop.eup %1470  ;;  %v822_v3 = vadd.f32 1.0, %v814_v45  ;;  %v741_v17 = vmul.f32 %v733_v53, %v2242_v29 }
 0x138   : > { %v743_v10 = vmul.f32 %v735_v0, %v2270_v31  ;;  %v517_v31 = vmul.f32 0.5, %v1966_v46 }
 0x139   : > { %v1473_v25 = vpop.eup %1472  ;;  %v830_v21 = vmul.f32 %v822_v3, %v518_v62  ;;  %v781_v36 = vmul.f32 %v1471_v20, %v741_v17 }
 0x13a   : > { %v783_v1 = vmul.f32 %v1473_v25, %v743_v10 }
 0x13b   : > { %v838_v42 = vpack.c.bf16 %v830_v21, %v828_v12  ;;  %v789_v30 = vsub.f32 1.0, %v781_v36 }
 0x13c   : > { %v791_v54 = vsub.f32 1.0, %v783_v1 }
 0x13d   : > { %981 = vmatmul.bf16.gmra.mxu2 %v838_v42  ;;  %v805_v16 = vsub.f32 0.0, %v789_v30 }
 0x13e   : > { %v807_v33 = vsub.f32 0.0, %v791_v54 }
 0x13f   : > { %v813_v52 = vsel %vm797_vm6, %v789_v30, %v805_v16 }
 0x140   : > { %v815_v37 = vsel %vm799_vm7, %v791_v54, %v807_v33  ;;  %v821_v29 = vadd.f32 1.0, %v813_v52 }
 0x141   : > { %v823_v23 = vadd.f32 1.0, %v815_v37 }
 0x142   : > { %v829_v44 = vmul.f32 %v821_v29, %v517_v31 }
 0x143   : > { %v831_v2 = vmul.f32 %v823_v23, %v519_v6 }
 0x145   : > { %v839_v4 = vpack.c.bf16 %v831_v2, %v829_v44 }
 0x147   : > { %1000 = vmatmul.bf16.gmra.mxu3 %v839_v4 }
 0x1ae   : > { %v977_v49 = vpop.f32.mrf.mxu2 }
 0x1b6   : > { %v979_v8 = vpop.f32.mrf.mxu2 }
 0x1b9   : > { %v996_v27 = vpop.f32.mrf.mxu3 }
 0x1ba   : > { %v997_v34 = vadd.f32 %v996_v27, %v977_v49 }
 0x1bc   : > { %v1006_v55 = vadd.f32 %v997_v34, %v832_v57 }
 0x1be   : > { %1010 = vst [vmem:[#allocation2 + $0x10] sm:$0xff] %v1006_v55 }
 0x1c0   : > { %v982_v46 = vpop.f32.mrf.mxu2 }
 0x1c1   : > { %v998_v39 = vpop.f32.mrf.mxu3 }
 0x1c2   : > { %v999_v58 = vadd.f32 %v998_v39, %v979_v8 }
 0x1c4   : > { %v1007_v43 = vadd.f32 %v999_v58, %v833_v56 }
 0x1c6   : > { %1011 = vst [vmem:[#allocation2] sm:$0xff] %v1007_v43 }
 0x1c8   : > { %v984_v11 = vpop.f32.mrf.mxu2 }
 0x1ca   : > { %v1001_v35 = vpop.f32.mrf.mxu3 }
 0x1cb   : > { %v1002_v63 = vadd.f32 %v1001_v35, %v982_v46 }
 0x1cd   : > { %v1008_v18 = vadd.f32 %v1002_v63, %v834_v28 }
 0x1cf   : > { %1012 = vst [vmem:[#allocation2 + $0x18] sm:$0xff] %v1008_v18 }
 0x1d2   : > { %v1003_v61 = vpop.f32.mrf.mxu3 }
 0x1d3   : > { %v1004_v40 = vadd.f32 %v1003_v61, %v984_v11  ;;  %1017 = sbr.rel (%p1312_p2) target bundleno = 482 (0x1e2), region = 64 }
 0x1d5   : > { %v1009_v48 = vadd.f32 %v1004_v40, %v835_v38 }
 0x1d7   : > { %1013 = vst [vmem:[#allocation2 + $0x8] sm:$0xff] %v1009_v48 }
 0x1d8   : > { %v1018_v13 = vld [vmem:[#allocation2 + $0x10] sm:$0xff]  ;;  %v1474_v7 = vld [vmem:[%s2338_s4] ss:$0 sm:$0xff]  ;;  %v1020_v41 = vld [vmem:[#allocation2 + $0x18] sm:$0xff] }
 0x1d9   : > { %v1019_v15 = vld [vmem:[#allocation2] sm:$0xff]  ;;  %v1026_v14 = vadd.f32 %v1474_v7, %v1018_v13  ;;  %v1028_v60 = vadd.f32 %v1474_v7, %v1020_v41 }
 0x1da   : > { %v1027_v19 = vadd.f32 %v1474_v7, %v1019_v15 }
 0x1db   : > { %1030 = vst [vmem:[#allocation11] sm:$0xff] %v1026_v14 }
 0x1dc   : > { %1031 = vst [vmem:[#allocation11 + $0x8] sm:$0xff] %v1027_v19 }
 0x1dd   : > { %1032 = vst [vmem:[#allocation11 + $0x10] sm:$0xff] %v1028_v60 }
 0x1de   : > { %v1021_v22 = vld [vmem:[#allocation2 + $0x8] sm:$0xff] }
 0x1df   : > { %v1029_v47 = vadd.f32 %v1474_v7, %v1021_v22 }
 0x1e1   : > { %1033 = vst [vmem:[#allocation11 + $0x18] sm:$0xff] %v1029_v47 }
 0x1e2 PF: > { %p1382_p3 = scmp.eq.s32.totalorder %s1797_s27, 1  ;;  %s2376_s25 = sld [smem:[#allocation22_spill]] }
 0x1e3   : > { %s1694_s8 = smov [#allocation11]   ;;  %s1695_s11 = smov 128  }
 0x1e4   : > { %s1042_s9 = sshll.u32 %s1694_s8, 4  ;;  %s1696_s28 = smov 8   ;;  %s1043_s9 = int_to_ptr.vmem [resolvable:$true] %s1042_s9 }
 0x1e8   : > { %s1044_s26 = sshll.u32 %s2376_s25, 4  ;;  %s1045_s26 = int_to_ptr.hbm [resolvable:$true] %s1044_s26 }
 0x1e9   : > { %1362 = dma.vmem_to_hbm [thread:$0]  (%p1382_p3), %s1043_s9, 512, %s1045_s26, [#allocation5], %s1695_s11, %s1695_s11, %s1696_s28  }
 0x1ea   : > { %1660 = dma.done.wait (%p1382_p3), [#allocation5], 512  }
 0x1eb   : > { %1662 = vsyncadd (%p1382_p3), [#allocation5], 4294966784 }
 0x1ec PF: > { %s2377_s7 = sld [smem:[#allocation17_spill]]  ;;  %s2381_s18 = smov %s1669_s19 }
 0x1ed   : > { %s2378_s10 = sld [smem:[#allocation16_spill]]  ;;  %s2383_s21 = smov %s1681_s22 }
 0x1ee   : > { %s2379_s20 = sld [smem:[#allocation19_spill]] }
 0x1ef   : > { %s2380_s27 = sld [smem:[#allocation18_spill]] }
 0x1f2   : > { %s23_s23 = sadd.s32 1, %s2377_s7  }
 0x1f3   : > { %p20_p4 = scmp.ge.s32.totalorder %s23_s23, 4   ;;  %s2382_s19 = smov %s2378_s10 }
 0x1f5   : > { %s2384_s22 = smov %s2380_s27  ;;  %22 = sbr.rel (!%p20_p4) target bundleno = 12 (0xc), region = 116 }
 0x1fa   :  { %1061 = vsyncpa [#allocation4], 1 }
 0x1fb   :  { %1063 = vsyncpa [#allocation4 + $0x1], 1 }
 0x1fc   :  { %1064 = vsyncpa [#allocation7], 1 }
 0x1fd   :  { %1066 = vsyncpa [#allocation7 + $0x1], 1 }
 0x1fe   :  { %1067 = vsyncpa [#allocation10], 1 }
 0x1ff   :  { %1069 = vsyncpa [#allocation10 + $0x1], 1 }
 0x200   :  { %1070 = vsyncpa [#allocation5], 1 }
 0x201   :  { %1072 = vsyncpa [#allocation5 + $0x1], 1 }

</bundles_post_ra>
